<compile_context>
chip_gen: v7x
topology: tpu7x:2x2x1
jax: 0.10.0
libtpu: 0.0.40
codegen_flags: <defaults>
</compile_context>

<pallas_src>
import jax
import jax.numpy as jnp
from jax.experimental import pallas as pl
from jax.experimental.pallas import tpu as pltpu


def _round_up(x, m):
    return (x + m - 1) // m * m


def critic_kernel(s_ref, a_ref, w1s_ref, w1a_ref, b1_ref, w2_ref, b2_ref,
                  wq_ref, bq_ref, q_ref):
    """Feature-major fused MLP tile.

      h1 (fc1, tm) = W1s @ s_t + W1a @ a_t + b1      (concat-free fc1)
      h2 (fc2, tm) = W2 @ relu(h1) + b2
      q  (1,  tm) = wq @ relu(h2) + bq

    bf16 operands feed the MXU; accumulation / bias / relu stay in f32.
    """
    h1 = (jnp.dot(w1s_ref[...], s_ref[...], preferred_element_type=jnp.float32)
          + jnp.dot(w1a_ref[...], a_ref[...], preferred_element_type=jnp.float32)
          + b1_ref[...])
    h1 = jnp.maximum(h1, 0.0).astype(w2_ref.dtype)

    h2 = jnp.dot(w2_ref[...], h1, preferred_element_type=jnp.float32) + b2_ref[...]
    h2 = jnp.maximum(h2, 0.0).astype(wq_ref.dtype)

    q = jnp.dot(wq_ref[...], h2, preferred_element_type=jnp.float32) + bq_ref[...]
    q_ref[...] = q.astype(q_ref.dtype)


def critic_forward(state, action, params, *, max_batch_tile=1024):
    """MADDPG critic forward: q(relu(fc2(relu(fc1([state, action])))))."""
    w1s, w1a, b1, w2, b2, wq, bq = params
    batch, d_state = state.shape
    d_act = action.shape[1]
    fc1 = w1s.shape[0]
    fc2 = w2.shape[0]
    assert max_batch_tile % 128 == 0

    # Feature-major inputs: batch on the lane axis.  The transpose fuses with
    # the bf16 cast in XLA (no-op if upstream already provides bf16).
    compute_dtype = jnp.bfloat16
    s_t = jnp.asarray(state, compute_dtype).T       # (d_state, B)
    a_t = jnp.asarray(action, compute_dtype).T      # (d_act,  B)
    w1s = jnp.asarray(w1s, compute_dtype)
    w1a = jnp.asarray(w1a, compute_dtype)
    w2 = jnp.asarray(w2, compute_dtype)
    wq = jnp.asarray(wq, compute_dtype)
    b1 = jnp.asarray(b1, jnp.float32)
    b2 = jnp.asarray(b2, jnp.float32)
    bq = jnp.asarray(bq, jnp.float32)

    # Tile selection:
    #  * batch < 256: one exact block (tm == batch) -> grid of 1, no masking,
    #    no per-step overhead (latency path).
    #  * batch >= 256: at least two grid steps so ("parallel",) shards the
    #    batch across v7x's two TensorCores; lane-dense 128-multiple tiles,
    #    capped at max_batch_tile (1024, a multiple of 256 for v6e/v7x MXU M).
    #    No jnp.pad: the ragged final block is handled by boundary masking.
    if batch < 256:
        tm = batch
    else:
        tm = min(max_batch_tile, _round_up(pl.cdiv(batch, 2), 128))
    grid = (pl.cdiv(batch, tm),)

    # Advisory cost hint so XLA schedules this small custom call sensibly.
    flops = 2 * batch * ((d_state + d_act) * fc1 + fc1 * fc2 + fc2)
    bytes_accessed = (2 * batch * (d_state + d_act) + 4 * batch
                      + 2 * ((d_state + d_act) * fc1 + fc1 * fc2 + fc2)
                      + 4 * (fc1 + fc2 + 1))

    def batch_tile(feat):
        return pl.BlockSpec((feat, tm), lambda i: (0, i))

    def resident(shape):
        # Same block index every grid step -> stays pinned in VMEM.
        return pl.BlockSpec(shape, lambda i: (0, 0))

    q_row = pl.pallas_call(
        critic_kernel,
        out_shape=jax.ShapeDtypeStruct((1, batch), jnp.float32),
        grid_spec=pltpu.PrefetchScalarGridSpec(
            num_scalar_prefetch=0,
            grid=grid,
            in_specs=[
                batch_tile(d_state),         # state^T tile   (d_state, tm)
                batch_tile(d_act),           # action^T tile  (d_act,  tm)
                resident((fc1, d_state)),    # W1, state columns
                resident((fc1, d_act)),      # W1, action columns
                resident((fc1, 1)),          # b1
                resident((fc2, fc1)),        # W2
                resident((fc2, 1)),          # b2
                resident((1, fc2)),          # wq
                resident((1, 1)),            # bq
            ],
            out_specs=pl.BlockSpec((1, tm), lambda i: (0, i)),
        ),
        compiler_params=pltpu.CompilerParams(
            dimension_semantics=("parallel",)),
        cost_estimate=pl.CostEstimate(
            flops=flops, transcendentals=0, bytes_accessed=bytes_accessed),
    )(s_t, a_t, w1s, w1a, b1, w2, b2, wq, bq)

    # (1, B) lane-dense row -> (B, 1); this transpose is just a reshape.
    return q_row.T


def init_critic_params(key, input_dims, fc1_dims, fc2_dims, n_agents, n_actions,
                       weight_dtype=jnp.bfloat16):
    """nn.Linear-style init U(-1/sqrt(fan_in), 1/sqrt(fan_in)).

    Weights are stored PyTorch-style (out, in) with the fc1 weight pre-split
    into state/action column blocks (concat-free fc1) and kept in bf16 for the
    MXU; biases stay f32 (added to the f32 accumulators).
    """
    d_act = n_agents * n_actions
    d_in = input_dims + d_act
    keys = jax.random.split(key, 7)

    def uniform(k, shape, fan_in):
        bound = 1.0 / jnp.sqrt(jnp.float32(fan_in))
        return jax.random.uniform(k, shape, jnp.float32, -bound, bound)

    w1s = uniform(keys[0], (fc1_dims, input_dims), d_in).astype(weight_dtype)
    w1a = uniform(keys[1], (fc1_dims, d_act), d_in).astype(weight_dtype)
    b1 = uniform(keys[2], (fc1_dims, 1), d_in)
    w2 = uniform(keys[3], (fc2_dims, fc1_dims), fc1_dims).astype(weight_dtype)
    b2 = uniform(keys[4], (fc2_dims, 1), fc1_dims)
    wq = uniform(keys[5], (1, fc2_dims), fc2_dims).astype(weight_dtype)
    bq = uniform(keys[6], (1, 1), fc2_dims)
    return (w1s, w1a, b1, w2, b2, wq, bq)


def reference_forward(state, action, params):
    """Plain-JAX reference (same bf16 input/weight quantization, f32 math)."""
    w1s, w1a, b1, w2, b2, wq, bq = [jnp.asarray(p, jnp.float32) for p in params]
    s = jnp.asarray(state, jnp.bfloat16).astype(jnp.float32)
    a = jnp.asarray(action, jnp.bfloat16).astype(jnp.float32)
    x = jnp.maximum(s @ w1s.T + a @ w1a.T + b1.T, 0.0)
    x = jnp.maximum(x @ w2.T + b2.T, 0.0)
    return x @ wq.T + bq


if __name__ == "__main__":
    # Small shapes consistent with the module's __init__ signature.
    batch = 8
    input_dims = 16      # state dim
    n_agents = 2
    n_actions = 4        # action input is (batch, n_agents * n_actions)
    fc1_dims = 32
    fc2_dims = 32

    key = jax.random.PRNGKey(0)
    k_s, k_a, k_p, k_s2, k_a2 = jax.random.split(key, 5)

    state = jax.random.normal(k_s, (batch, input_dims), jnp.float32)
    action = jax.random.normal(k_a, (batch, n_agents * n_actions), jnp.float32)
    params = init_critic_params(k_p, input_dims, fc1_dims, fc2_dims,
                                n_agents, n_actions)

    # 1) Small-batch latency path: single exact block, grid of 1.
    q = jax.block_until_ready(critic_forward(state, action, params))
    q_ref = reference_forward(state, action, params)
    assert q.shape == (batch, 1), q.shape
    assert jnp.allclose(q, q_ref, atol=2e-2, rtol=2e-2), "mismatch (small batch)"

    # 2) batch >= 256, not a multiple of the tile: >= 2 grid steps (both v7x
    #    TCs busy), resident weights, ragged final block handled by masking.
    big_batch = 300
    state2 = jax.random.normal(k_s2, (big_batch, input_dims), jnp.float32)
    action2 = jax.random.normal(k_a2, (big_batch, n_agents * n_actions), jnp.float32)
    q2 = jax.block_until_ready(critic_forward(state2, action2, params))
    q2_ref = reference_forward(state2, action2, params)
    assert q2.shape == (big_batch, 1), q2.shape
    assert jnp.allclose(q2, q2_ref, atol=2e-2, rtol=2e-2), "mismatch (batch grid)"

    # 3) Capped tile: > 2 grid steps + ragged edge with resident weights.
    q3 = jax.block_until_ready(
        critic_forward(state2, action2, params, max_batch_tile=128))
    assert q3.shape == (big_batch, 1), q3.shape
    assert jnp.allclose(q3, q2_ref, atol=2e-2, rtol=2e-2), "mismatch (capped tile)"

    # TODO(synk): Adam optimizer, checkpoint save/load and device placement from
    # the PyTorch module are host-side concerns, not part of the forward kernel.
    print("KERNEL_OK")
</pallas_src>

<mosaic_0001>
module attributes {stable_mosaic.version = 11 : i64} {
  func.func @critic_kernel(%arg0: i32, %arg1: memref<16x8xbf16, #tpu.memory_space<vmem>>, %arg2: memref<8x8xbf16, #tpu.memory_space<vmem>>, %arg3: memref<32x16xbf16, #tpu.memory_space<vmem>>, %arg4: memref<32x8xbf16, #tpu.memory_space<vmem>>, %arg5: memref<32x1xf32, #tpu.memory_space<vmem>>, %arg6: memref<32x32xbf16, #tpu.memory_space<vmem>>, %arg7: memref<32x1xf32, #tpu.memory_space<vmem>>, %arg8: memref<1x32xbf16, #tpu.memory_space<vmem>>, %arg9: memref<1x1xf32, #tpu.memory_space<vmem>>, %arg10: memref<1x8xf32, #tpu.memory_space<vmem>>) attributes {dimension_semantics = [#tpu.dimension_semantics<parallel>], iteration_bounds = array<i64: 1>, scalar_prefetch = 0 : i64, scratch_operands = 0 : i64, tpu.core_type = #tpu.core_type<tc>, window_params = [{transform_indices = @transform_0, window_bounds = array<i64: 16, 8>}, {transform_indices = @transform_1, window_bounds = array<i64: 8, 8>}, {pipeline_mode = #tpu.pipeline_mode<synchronous>, transform_indices = @transform_2, window_bounds = array<i64: 32, 16>}, {pipeline_mode = #tpu.pipeline_mode<synchronous>, transform_indices = @transform_3, window_bounds = array<i64: 32, 8>}, {pipeline_mode = #tpu.pipeline_mode<synchronous>, transform_indices = @transform_4, window_bounds = array<i64: 32, 1>}, {pipeline_mode = #tpu.pipeline_mode<synchronous>, transform_indices = @transform_5, window_bounds = array<i64: 32, 32>}, {pipeline_mode = #tpu.pipeline_mode<synchronous>, transform_indices = @transform_6, window_bounds = array<i64: 32, 1>}, {pipeline_mode = #tpu.pipeline_mode<synchronous>, transform_indices = @transform_7, window_bounds = array<i64: 1, 32>}, {pipeline_mode = #tpu.pipeline_mode<synchronous>, transform_indices = @transform_8, window_bounds = array<i64: 1, 1>}, {transform_indices = @transform_9, window_bounds = array<i64: 1, 8>}]} {
    %c0 = arith.constant 0 : index
    %c0_0 = arith.constant 0 : index
    %0 = vector.load %arg3[%c0, %c0_0] : memref<32x16xbf16, #tpu.memory_space<vmem>>, vector<32x16xbf16>
    %c0_1 = arith.constant 0 : index
    %c0_2 = arith.constant 0 : index
    %1 = vector.load %arg1[%c0_1, %c0_2] : memref<16x8xbf16, #tpu.memory_space<vmem>>, vector<16x8xbf16>
    %cst = arith.constant dense<0.000000e+00> : vector<32x8xf32>
    %2 = tpu.matmul %0, %1, %cst {dimension_numbers = #tpu.dot_dimension_numbers<[1], [0], [0], [1], [0, 0, 1, 1], [], []>} : vector<32x16xbf16>, vector<16x8xbf16>, vector<32x8xf32> -> vector<32x8xf32>
    %c0_3 = arith.constant 0 : index
    %c0_4 = arith.constant 0 : index
    %3 = vector.load %arg4[%c0_3, %c0_4] : memref<32x8xbf16, #tpu.memory_space<vmem>>, vector<32x8xbf16>
    %c0_5 = arith.constant 0 : index
    %c0_6 = arith.constant 0 : index
    %4 = vector.load %arg2[%c0_5, %c0_6] : memref<8x8xbf16, #tpu.memory_space<vmem>>, vector<8x8xbf16>
    %cst_7 = arith.constant dense<0.000000e+00> : vector<32x8xf32>
    %5 = tpu.matmul %3, %4, %cst_7 {dimension_numbers = #tpu.dot_dimension_numbers<[1], [0], [0], [1], [0, 0, 1, 1], [], []>} : vector<32x8xbf16>, vector<8x8xbf16>, vector<32x8xf32> -> vector<32x8xf32>
    %6 = arith.addf %2, %5 : vector<32x8xf32>
    %c0_8 = arith.constant 0 : index
    %c0_9 = arith.constant 0 : index
    %7 = vector.load %arg5[%c0_8, %c0_9] : memref<32x1xf32, #tpu.memory_space<vmem>>, vector<32x1xf32>
    %8 = vector.broadcast %7 : vector<32x1xf32> to vector<32x8xf32>
    %9 = arith.addf %6, %8 : vector<32x8xf32>
    %cst_10 = arith.constant 0.000000e+00 : f32
    %10 = vector.broadcast %cst_10 : f32 to vector<32x8xf32>
    %11 = arith.maximumf %9, %10 : vector<32x8xf32>
    %12 = arith.truncf %11 : vector<32x8xf32> to vector<32x8xbf16>
    %c0_11 = arith.constant 0 : index
    %c0_12 = arith.constant 0 : index
    %13 = vector.load %arg6[%c0_11, %c0_12] : memref<32x32xbf16, #tpu.memory_space<vmem>>, vector<32x32xbf16>
    %cst_13 = arith.constant dense<0.000000e+00> : vector<32x8xf32>
    %14 = tpu.matmul %13, %12, %cst_13 {dimension_numbers = #tpu.dot_dimension_numbers<[1], [0], [0], [1], [0, 0, 1, 1], [], []>} : vector<32x32xbf16>, vector<32x8xbf16>, vector<32x8xf32> -> vector<32x8xf32>
    %c0_14 = arith.constant 0 : index
    %c0_15 = arith.constant 0 : index
    %15 = vector.load %arg7[%c0_14, %c0_15] : memref<32x1xf32, #tpu.memory_space<vmem>>, vector<32x1xf32>
    %16 = vector.broadcast %15 : vector<32x1xf32> to vector<32x8xf32>
    %17 = arith.addf %14, %16 : vector<32x8xf32>
    %cst_16 = arith.constant 0.000000e+00 : f32
    %18 = vector.broadcast %cst_16 : f32 to vector<32x8xf32>
    %19 = arith.maximumf %17, %18 : vector<32x8xf32>
    %20 = arith.truncf %19 : vector<32x8xf32> to vector<32x8xbf16>
    %c0_17 = arith.constant 0 : index
    %c0_18 = arith.constant 0 : index
    %21 = vector.load %arg8[%c0_17, %c0_18] : memref<1x32xbf16, #tpu.memory_space<vmem>>, vector<1x32xbf16>
    %cst_19 = arith.constant dense<0.000000e+00> : vector<1x8xf32>
    %22 = tpu.matmul %21, %20, %cst_19 {dimension_numbers = #tpu.dot_dimension_numbers<[1], [0], [0], [1], [0, 0, 1, 1], [], []>} : vector<1x32xbf16>, vector<32x8xbf16>, vector<1x8xf32> -> vector<1x8xf32>
    %c0_20 = arith.constant 0 : index
    %c0_21 = arith.constant 0 : index
    %23 = vector.load %arg9[%c0_20, %c0_21] : memref<1x1xf32, #tpu.memory_space<vmem>>, vector<1x1xf32>
    %24 = vector.broadcast %23 : vector<1x1xf32> to vector<1x8xf32>
    %25 = arith.addf %22, %24 : vector<1x8xf32>
    %c0_22 = arith.constant 0 : index
    %c0_23 = arith.constant 0 : index
    %26 = vector.load %arg10[%c0_22, %c0_23] : memref<1x8xf32, #tpu.memory_space<vmem>>, vector<1x8xf32>
    tpu.vector_store %arg10[%c0_22, %c0_23], %25 {strides = array<i32>} : memref<1x8xf32, #tpu.memory_space<vmem>>, vector<1x8xf32>,
    return
  }
  func.func @transform_0(%arg0: i32) -> (i32, i32) {
    %c0_i32 = arith.constant 0 : i32
    %c0_i32_0 = arith.constant 0 : i32
    return %c0_i32, %arg0 : i32, i32
  }
  func.func @transform_1(%arg0: i32) -> (i32, i32) {
    %c0_i32 = arith.constant 0 : i32
    %c0_i32_0 = arith.constant 0 : i32
    return %c0_i32, %arg0 : i32, i32
  }
  func.func @transform_2(%arg0: i32) -> (i32, i32) {
    %c0_i32 = arith.constant 0 : i32
    %c0_i32_0 = arith.constant 0 : i32
    %c0_i32_1 = arith.constant 0 : i32
    return %c0_i32, %c0_i32_0 : i32, i32
  }
  func.func @transform_3(%arg0: i32) -> (i32, i32) {
    %c0_i32 = arith.constant 0 : i32
    %c0_i32_0 = arith.constant 0 : i32
    %c0_i32_1 = arith.constant 0 : i32
    return %c0_i32, %c0_i32_0 : i32, i32
  }
  func.func @transform_4(%arg0: i32) -> (i32, i32) {
    %c0_i32 = arith.constant 0 : i32
    %c0_i32_0 = arith.constant 0 : i32
    %c0_i32_1 = arith.constant 0 : i32
    return %c0_i32, %c0_i32_0 : i32, i32
  }
  func.func @transform_5(%arg0: i32) -> (i32, i32) {
    %c0_i32 = arith.constant 0 : i32
    %c0_i32_0 = arith.constant 0 : i32
    %c0_i32_1 = arith.constant 0 : i32
    return %c0_i32, %c0_i32_0 : i32, i32
  }
  func.func @transform_6(%arg0: i32) -> (i32, i32) {
    %c0_i32 = arith.constant 0 : i32
    %c0_i32_0 = arith.constant 0 : i32
    %c0_i32_1 = arith.constant 0 : i32
    return %c0_i32, %c0_i32_0 : i32, i32
  }
  func.func @transform_7(%arg0: i32) -> (i32, i32) {
    %c0_i32 = arith.constant 0 : i32
    %c0_i32_0 = arith.constant 0 : i32
    %c0_i32_1 = arith.constant 0 : i32
    return %c0_i32, %c0_i32_0 : i32, i32
  }
  func.func @transform_8(%arg0: i32) -> (i32, i32) {
    %c0_i32 = arith.constant 0 : i32
    %c0_i32_0 = arith.constant 0 : i32
    %c0_i32_1 = arith.constant 0 : i32
    return %c0_i32, %c0_i32_0 : i32, i32
  }
  func.func @transform_9(%arg0: i32) -> (i32, i32) {
    %c0_i32 = arith.constant 0 : i32
    %c0_i32_0 = arith.constant 0 : i32
    return %c0_i32, %arg0 : i32, i32
  }
}

</mosaic_0001>

<bundles_post_ra>
// kernel: tpu_custom_call.1
= control target key start
LH: loop header
LB: loop body
LE: loop exit
PB: predicated region body
PF: predicated region fallthrough
CT: control target
= control target key end

     0   :  { %s615_s0 = inlined_call_operand.vmem [shape: bf16[16,8], index: 0, kind: input, shape index: {}]   ;;  %s616_s1 = inlined_call_operand.vmem [shape: bf16[8,8], index: 1, kind: input, shape index: {}]   ;;  %s617_s2 = inlined_call_operand.vmem [shape: bf16[32,16], index: 2, kind: input, shape index: {}]   ;;  %s618_s3 = inlined_call_operand.vmem [shape: bf16[32,8], index: 3, kind: input, shape index: {}]   ;;  %s619_s4 = inlined_call_operand.vmem [shape: f32[32,1], index: 4, kind: input, shape index: {}]   ;;  %s620_s5 = inlined_call_operand.vmem [shape: bf16[32,32], index: 5, kind: input, shape index: {}]   ;;  %s621_s6 = inlined_call_operand.vmem [shape: f32[32,1], index: 6, kind: input, shape index: {}]   ;;  %s622_s7 = inlined_call_operand.vmem [shape: bf16[1,32], index: 7, kind: input, shape index: {}]   ;;  %s623_s8 = inlined_call_operand.<no memory space> [shape: f32[1,1], index: 8, kind: input, shape index: {}]   ;;  %s624_s9 = inlined_call_operand.hbm [shape: f32[1,8], index: 9, kind: output, shape index: {}]  }
   0x1   :  { %v14_v0 = vstv %s623_s8 }
   0x2   :  { %15 = vst [vmem:[#allocation2] sm:$0x1] %v14_v0 }
   0x3   :  { %v46_v1 = vld [vmem:[%s616_s1] sm:$0xf]  ;;  %vm64_vm0 = vcmask 1043456   ;;  %vm57_vm1 = vcmask 64512   ;;  %v460_v4 = vld [vmem:[%s618_s3 + $0x8] sm:$0xff]   ;;  %vm133_vm2 = vcmask 130048  }
   0x4   :  { %v459_v2 = vld [vmem:[%s618_s3] sm:$0xff]   ;;  %452 = vmatprep.subr.msk.bf16.mxu0 %vm64_vm0, %v46_v1  ;;  %v66_v3 = vsel %vm64_vm0, %v46_v1, 0  ;;  %v490_v7 = vmov 0   ;;  %v191_v9 = vld [vmem:[%s619_s4 + $0x10] sm:$0xff]  ;;  %v190_v10 = vld [vmem:[%s619_s4 + $0x8] sm:$0xff] }
   0x5   :  { %421 = vmatpush3.bf16.msra.mxu0 %v66_v3  ;;  %422 = vmatprep.mubr.msk.bf16.mxu0 %vm57_vm1, %v459_v2  ;;  %v461_v5 = vld [vmem:[%s615_s0] sm:$0xff]   ;;  %v192_v11 = vld [vmem:[%s619_s4 + $0x18] sm:$0xff] }
   0x6   :  { %v462_v6 = vld [vmem:[%s617_s2] sm:$0xff]   ;;  %457 = vset.pattern.permute.xlu0 %v490_v7  ;;  %458 = vset.pattern.permute.xlu1 %v490_v7 }
   0x7   :  { %426 = vmatprep.subr.bf16.mxu0 %v461_v5  ;;  %v189_v8 = vld [vmem:[%s619_s4] sm:$0xff]  ;;  %205 = vperm.xlu1 %458, %v191_v9  }
   0x8   :  { %423 = vmatmul.mubr.msk.bf16.vlgmr.msra.gmra.mrb[0].mxu0 %vm57_vm1, %v460_v4  ;;  %195 = vperm.xlu0 %457, %v189_v8  }
   0x9   :  { %427 = vmatpush3.bf16.msra.mxu0 %v461_v5  ;;  %428 = vmatprep.mubr.msk.bf16.mxu0 %vm133_vm2, %v462_v6 }
   0xa   :  { %16 = vsyncpa [#allocation4], 0  ;;  %v227_v12 = vld [vmem:[%s621_s6] sm:$0xff]  ;;  %v228_v13 = vld [vmem:[%s621_s6 + $0x8] sm:$0xff]  ;;  %vm261_vm3 = vcmask 261120   ;;  %v491_v38 = vmov 0.0   ;;  %v330_v58 = vlaneseq }
   0xb   :  { %210 = vperm.xlu1 %458, %v192_v11   ;;  %v463_v14 = vld [vmem:[%s617_s2 + $0x8] sm:$0xff]   ;;  %v229_v15 = vld [vmem:[%s621_s6 + $0x10] sm:$0xff]  ;;  %v230_v16 = vld [vmem:[%s621_s6 + $0x18] sm:$0xff]  ;;  %vm492_vm4 = vmmov 0   ;;  %s493_s16 = smov [#allocation3]   ;;  %vm377_vm5 = vcmask 57344  }
   0xc   :  { %200 = vperm.xlu0 %457, %v190_v10   ;;  %v324_v17 = vld [vmem:[#allocation2] sm:$0x1]  ;;  %v465_v37 = vld [vmem:[%s620_s5 + $0x8] sm:$0xff]   ;;  %v331_v59 = vshrl.u32 %v330_v58, 7  ;;  %s385_s8 = sshll.u32 %s493_s16, 4  ;;  %s386_s8 = int_to_ptr.vmem [resolvable:$true] %s385_s8 }
   0xd   :  { %v464_v18 = vld [vmem:[%s620_s5] sm:$0xff]   ;;  %s466_s17 = scalar_lea.vmem %s386_s8, 16  ;;  %p471_p1 = scmp.lt.s32.totalorder %s386_s8, %s386_s8 }
   0xe   :  { %436 = vmatprep.mubr.msk.bf16.mxu1 %vm261_vm3, %v464_v18  ;;  %v323_v57 = vld [vmem:[%s622_s7] sm:$0x1]  ;;  %v332_v60 = vsub.s32 0, %v331_v59  ;;  %p467_p0 = scmp.ne.s32.totalorder %s386_s8, %s466_s17  ;;  %s470_s7 = scalar_lea.vmem %s386_s8, 32 }
   0xf   :  { %238 = vperm.xlu1 %458, %v228_v13   ;;  %p472_p2 = scmp.lt.s32.totalorder %s470_s7, %s466_s17 }
  0x10   :  { %233 = vperm.xlu0 %457, %v227_v12  }
  0x11   :  { %p473_p3 = por %p472_p2, %p471_p1 }
  0x13   :  { %248 = vperm.xlu1 %458, %v230_v16   ;;  %p474_p4 = pnand %p473_p3, %p467_p0 }
  0x14   :  { %429 = vmatmul.mubr.msk.bf16.vlgmr.msra.gmra.mrb[0].mxu0 %vm133_vm2, %v463_v14  ;;  %243 = vperm.xlu0 %457, %v229_v15  }
  0x18   :  { %327 = vperm.xlu0 %457, %v324_v17  }
  0x86   :  { %v206_v19 = vpop.permute.xlu1 %205 }
  0x87   :  { %v196_v20 = vpop.permute.xlu0 %195 }
  0x8a   :  { %v211_v24 = vpop.permute.xlu1 %210 }
  0x8b   :  { %v201_v27 = vpop.permute.xlu0 %200 }
  0x8e   :  { %v239_v40 = vpop.permute.xlu1 %238 }
  0x8f   :  { %v234_v39 = vpop.permute.xlu0 %233 }
  0x92   :  { %v249_v45 = vpop.permute.xlu1 %248 }
  0x93   :  { %v244_v41 = vpop.permute.xlu0 %243 }
  0x97   :  { %v328_v61 = vpop.permute.xlu0 %327 }
  0x98   :  { %v333_v62 = vrot.slane %v328_v61, %v332_v60 }
  0xe7   :  { %v430_v21 = vpop.f32.mrb[0].mxu0 }
  0xe8   :  { %v215_v22 = vadd.f32 %v430_v21, %v206_v19  ;;  %v174_v23 = vpop.f32.mrb[1].mxu0 }
  0xe9   :  { %v213_v25 = vadd.f32 %v196_v20, %v174_v23  ;;  %v431_v26 = vpop.f32.mrb[2].mxu0 }
  0xea   :  { %v216_v28 = vadd.f32 %v431_v26, %v211_v24  ;;  %v177_v29 = vpop.f32.mrb[3].mxu0  ;;  %v219_v31 = vmax.f32 %v215_v22, 0.0 }
  0xeb   :  { %v214_v30 = vadd.f32 %v201_v27, %v177_v29  ;;  %v217_v33 = vmax.f32 %v213_v25, 0.0 }
  0xec   :  { %v220_v32 = vmax.f32 %v216_v28, 0.0 }
  0xed   :  { %v218_v34 = vmax.f32 %v214_v30, 0.0 }
  0xee   :  { %v222_v35 = vpack.c.bf16 %v220_v32, %v219_v31 }
  0xef   :  { %v221_v36 = vpack.c.bf16 %v218_v34, %v217_v33 }
  0xf1   :  { %432 = vmatprep.subr.bf16.mxu1 %v221_v36 }
  0xf2   :  { %433 = vmatpush3.bf16.msra.mxu1 %v221_v36 }
  0xf3   :  { %434 = vmatprep.subr.bf16.mxu1 %v222_v35 }
  0xf6   :  { %435 = vmatpush3.bf16.msra.mxu1 %v222_v35 }
  0xf7   :  { %440 = vmatprep.subr.bf16.mxu1 %v491_v38 }
  0xf9   :  { %437 = vmatmul.mubr.msk.bf16.vlgmr.msra.gmra.mrb[0].mxu1 %vm261_vm3, %v465_v37 }
  0xfa   :  { %444 = vmatprep.mubr.msk.bf16.mxu1 %vm492_vm4, %v491_v38 }
 0x1cc   :  { %v438_v42 = vpop.f32.mrb[0].mxu1 }
 0x1cd   :  { %v311_v43 = vadd.f32 %v438_v42, %v244_v41  ;;  %v302_v44 = vpop.f32.mrb[1].mxu1 }
 0x1ce   :  { %v303_v46 = vadd.f32 %v302_v44, %v234_v39  ;;  %v439_v47 = vpop.f32.mrb[2].mxu1 }
 0x1cf   :  { %v314_v48 = vadd.f32 %v439_v47, %v249_v45  ;;  %v305_v49 = vpop.f32.mrb[3].mxu1  ;;  %v319_v51 = vmax.f32 %v311_v43, 0.0 }
 0x1d0   :  { %v306_v50 = vadd.f32 %v305_v49, %v239_v40  ;;  %v317_v53 = vmax.f32 %v303_v46, 0.0 }
 0x1d1   :  { %v320_v52 = vmax.f32 %v314_v48, 0.0 }
 0x1d2   :  { %v318_v54 = vmax.f32 %v306_v50, 0.0 }
 0x1d3   :  { %v322_v55 = vpack.c.bf16 %v320_v52, %v319_v51 }
 0x1d4   :  { %v321_v56 = vpack.c.bf16 %v318_v54, %v317_v53 }
 0x1d6   :  { %441 = vmatpush3.bf16.msra.mxu1 %v321_v56 }
 0x1d7   :  { %442 = vmatprep.subr.bf16.mxu1 %v491_v38 }
 0x1da   :  { %443 = vmatpush3.bf16.msra.mxu1 %v322_v55 }
 0x1dd   :  { %445 = vmatmul.mubr.msk.bf16.vlgmr.msra.gmra.mrb[4].mxu1 %vm261_vm3, %v323_v57 }
 0x2b0   :  { %v371_v63 = vpop.f32.mrb[4].mxu1 }
 0x2b1   :  { %v372_v0 = vadd.f32 %v371_v63, %v333_v62  ;;  %v446_v1 = vpop.f32.mrb[5].mxu1 }
 0x2b2   :  { %v374_v2 = vpop.f32.mrb[6].mxu1 }
 0x2b3   :  { %v447_v3 = vpop.f32.mrb[7].mxu1  ;;  %378 = vst.msk [vmem:[#allocation3] sm:$0x1] %vm377_vm5, %v372_v0 }
 0x2b4   :  { %477 = shalt.err (!%p474_p4)
}
 0x2b5   :  { %s478_s19 = scalar_lea.hbm %s624_s9, 16 }
 0x2b6   :  { %p479_p5 = scmp.ne.s32.totalorder %s624_s9, %s478_s19  ;;  %p482_p6 = scmp.lt.u32.totalorder %s478_s19, %s624_s9 }
 0x2b8   :  { %p484_p7 = pnand %p482_p6, %p479_p5 }
 0x2ba   :  { %487 = shalt.err (!%p484_p7)
}
 0x2bb   :  { %388 = dma.vmem_to_hbm [thread:$0]  %s386_s8, 16, %s624_s9, [#allocation4]  }
 0x2bc   :  { %488 = dma.done.wait [#allocation4], 16  }
 0x2bd   :  { %489 = vsyncadd [#allocation4], 4294967280 }
 0x2be   :  { %392 = vsyncpa [#allocation4], 1 }

</bundles_post_ra>
